<compile_context>
chip_gen: v7x
topology: tpu7x:2x2x1
jax: 0.10.0
libtpu: 0.0.40
codegen_flags: <defaults>
</compile_context>

<pallas_src>
import jax
import jax.numpy as jnp
from jax.experimental import pallas as pl
from jax.experimental.pallas import tpu as pltpu


# ---------------------------------------------------------------------------
# Pallas kernel: per-element IoU on an (8, TR, L) coordinate-major block.
# ---------------------------------------------------------------------------

def _iou_kernel(b_ref, o_ref):
    # b_ref: (8, TR, L); rows 0..3 = bbox1 (x1, y1, x2, y2),
    #                    rows 4..7 = bbox2 (x1, y1, x2, y2).
    x1a, y1a, x2a, y2a = b_ref[0], b_ref[1], b_ref[2], b_ref[3]   # each (TR, L)
    x1b, y1b, x2b, y2b = b_ref[4], b_ref[5], b_ref[6], b_ref[7]

    area1 = (x2a - x1a) * (y2a - y1a)
    area2 = (x2b - x1b) * (y2b - y1b)

    lt_x = jnp.maximum(x1a, x1b)                 # intersection left/top
    lt_y = jnp.maximum(y1a, y1b)
    rb_x = jnp.minimum(x2a, x2b)                 # intersection right/bottom
    rb_y = jnp.minimum(y2a, y2b)

    ow = jnp.maximum(rb_x - lt_x, 0.0)           # clip(0)
    oh = jnp.maximum(rb_y - lt_y, 0.0)
    overlap = ow * oh

    union = area1 + area2 - overlap
    # Exact reciprocal on the EUP slot keeps the divide off the VALU slots;
    # semantics match torch's overlap/union (Inf/NaN for degenerate union==0).
    o_ref[...] = (overlap * pl.reciprocal(union, approx=False)).astype(o_ref.dtype)


# ---------------------------------------------------------------------------
# Wrapper: layout plumbing (stack + pad + transpose), tiled pallas_call, un-pad.
# ---------------------------------------------------------------------------

def _round_up(x, m):
    return pl.cdiv(x, m) * m


def iou_of(bbox1, bbox2, *, max_lanes=512, max_rows_per_block=256, target_steps=8):
    """Per-row IoU of two (N, 4) box arrays.  Returns shape (N,) float32."""
    assert bbox1.shape == bbox2.shape and bbox1.shape[-1] == 4, (bbox1.shape, bbox2.shape)
    n = bbox1.shape[0]

    # --- tiling (all static at trace time) ---------------------------------
    # Lane width: multiple of 128, capped, so tiny N pads at most one tile.
    lanes = min(max_lanes, max(128, _round_up(n, 128)))
    rows_needed = pl.cdiv(n, lanes)
    rows8 = _round_up(rows_needed, 8)            # sublane-dense row count
    # Rows per grid step: large enough to amortize the ~0.35us per-step cost,
    # small enough to keep ~target_steps steps (v7x megacore) and a <=4 MiB
    # input block (fits scoped VMEM with double buffering on v5e/v6e/v7x).
    tr = min(max_rows_per_block,
             max(8, _round_up(pl.cdiv(rows8, target_steps), 8)))
    rows_total = _round_up(rows8, tr)
    n_pad = rows_total * lanes

    # --- wrapper-side layout plumbing --------------------------------------
    # Stack both box sets row-wise: (N, 8) = [x1a y1a x2a y2a | x1b y1b x2b y2b].
    stacked = jnp.concatenate(
        [bbox1.astype(jnp.float32), bbox2.astype(jnp.float32)], axis=1)
    pad = n_pad - n
    if pad:
        # Pad with unit boxes [0,0,1,1] for both sets: padded lanes give
        # IoU == 1, so no 0/0; they are sliced off below.
        unit = jnp.array([0.0, 0.0, 1.0, 1.0, 0.0, 0.0, 1.0, 1.0], jnp.float32)
        stacked = jnp.concatenate(
            [stacked, jnp.broadcast_to(unit, (pad, 8))], axis=0)
    # Coordinate-major slab: (n_pad, 8) -> (8, n_pad) -> (8, rows_total, lanes).
    # The final reshape is a free row-major split of the last axis.
    data = jnp.transpose(stacked, (1, 0)).reshape(8, rows_total, lanes)

    grid = (rows_total // tr,)
    out = pl.pallas_call(
        _iou_kernel,
        out_shape=jax.ShapeDtypeStruct((rows_total, lanes), jnp.float32),
        grid=grid,
        in_specs=[pl.BlockSpec((8, tr, lanes), lambda i: (0, i, 0))],
        out_specs=pl.BlockSpec((tr, lanes), lambda i: (i, 0)),
        compiler_params=pltpu.CompilerParams(
            dimension_semantics=("parallel",),   # shard grid steps across TCs on v7x
        ),
    )(data)

    return out.reshape(n_pad)[:n]


# ---------------------------------------------------------------------------
# Pure-JAX reference (mirrors the PyTorch module exactly).
# ---------------------------------------------------------------------------

def iou_of_ref(bbox1, bbox2):
    area1 = (bbox1[:, 2] - bbox1[:, 0]) * (bbox1[:, 3] - bbox1[:, 1])
    area2 = (bbox2[:, 2] - bbox2[:, 0]) * (bbox2[:, 3] - bbox2[:, 1])
    lt = jnp.maximum(bbox1[:, :2], bbox2[:, :2])
    rb = jnp.minimum(bbox1[:, 2:], bbox2[:, 2:])
    overlap_coord = jnp.maximum(rb - lt, 0.0)    # clip(0); avoids removed a_min kwarg
    overlap = overlap_coord[:, 0] * overlap_coord[:, 1]
    union = area1 + area2 - overlap
    return overlap / union


# ---------------------------------------------------------------------------

if __name__ == "__main__":
    key = jax.random.PRNGKey(0)
    k1, k2, k3, k4 = jax.random.split(key, 4)

    n = 8  # small example consistent with ([-1, -1], float32) box tensors

    def make_boxes(kxy, kwh):
        xy = jax.random.uniform(kxy, (n, 2), jnp.float32, 0.0, 10.0)
        wh = jax.random.uniform(kwh, (n, 2), jnp.float32, 1.0, 5.0)
        return jnp.concatenate([xy, xy + wh], axis=1)          # (n, 4) valid boxes

    bbox1 = make_boxes(k1, k2)
    bbox2 = make_boxes(k3, k4)

    fwd = jax.jit(iou_of)
    result = fwd(bbox1, bbox2)
    jax.block_until_ready(result)

    expected = iou_of_ref(bbox1, bbox2)

    assert result.shape == (n,), result.shape
    assert result.dtype == jnp.float32
    assert bool(jnp.all(jnp.isfinite(result)))
    assert bool(jnp.allclose(result, expected, rtol=1e-5, atol=1e-6)), (result, expected)
    print("KERNEL_OK")
</pallas_src>

<mosaic_0001>
module attributes {stable_mosaic.version = 11 : i64} {
  func.func @_iou_kernel(%arg0: i32, %arg1: memref<8x8x128xf32, #tpu.memory_space<vmem>>, %arg2: memref<8x128xf32, #tpu.memory_space<vmem>>) attributes {dimension_semantics = [#tpu.dimension_semantics<parallel>], iteration_bounds = array<i64: 1>, scalar_prefetch = 0 : i64, scratch_operands = 0 : i64, tpu.core_type = #tpu.core_type<tc>, window_params = [{transform_indices = @transform_0, window_bounds = array<i64: 8, 8, 128>}, {transform_indices = @transform_1, window_bounds = array<i64: 8, 128>}]} {
    %c0 = arith.constant 0 : index
    %c0_0 = arith.constant 0 : index
    %c0_1 = arith.constant 0 : index
    %0 = vector.load %arg1[%c0, %c0_0, %c0_1] : memref<8x8x128xf32, #tpu.memory_space<vmem>>, vector<1x8x128xf32>
    %1 = vector.shape_cast %0 : vector<1x8x128xf32> to vector<8x128xf32>
    %c1 = arith.constant 1 : index
    %c0_2 = arith.constant 0 : index
    %c0_3 = arith.constant 0 : index
    %2 = vector.load %arg1[%c1, %c0_2, %c0_3] : memref<8x8x128xf32, #tpu.memory_space<vmem>>, vector<1x8x128xf32>
    %3 = vector.shape_cast %2 : vector<1x8x128xf32> to vector<8x128xf32>
    %c2 = arith.constant 2 : index
    %c0_4 = arith.constant 0 : index
    %c0_5 = arith.constant 0 : index
    %4 = vector.load %arg1[%c2, %c0_4, %c0_5] : memref<8x8x128xf32, #tpu.memory_space<vmem>>, vector<1x8x128xf32>
    %5 = vector.shape_cast %4 : vector<1x8x128xf32> to vector<8x128xf32>
    %c3 = arith.constant 3 : index
    %c0_6 = arith.constant 0 : index
    %c0_7 = arith.constant 0 : index
    %6 = vector.load %arg1[%c3, %c0_6, %c0_7] : memref<8x8x128xf32, #tpu.memory_space<vmem>>, vector<1x8x128xf32>
    %7 = vector.shape_cast %6 : vector<1x8x128xf32> to vector<8x128xf32>
    %c4 = arith.constant 4 : index
    %c0_8 = arith.constant 0 : index
    %c0_9 = arith.constant 0 : index
    %8 = vector.load %arg1[%c4, %c0_8, %c0_9] : memref<8x8x128xf32, #tpu.memory_space<vmem>>, vector<1x8x128xf32>
    %9 = vector.shape_cast %8 : vector<1x8x128xf32> to vector<8x128xf32>
    %c5 = arith.constant 5 : index
    %c0_10 = arith.constant 0 : index
    %c0_11 = arith.constant 0 : index
    %10 = vector.load %arg1[%c5, %c0_10, %c0_11] : memref<8x8x128xf32, #tpu.memory_space<vmem>>, vector<1x8x128xf32>
    %11 = vector.shape_cast %10 : vector<1x8x128xf32> to vector<8x128xf32>
    %c6 = arith.constant 6 : index
    %c0_12 = arith.constant 0 : index
    %c0_13 = arith.constant 0 : index
    %12 = vector.load %arg1[%c6, %c0_12, %c0_13] : memref<8x8x128xf32, #tpu.memory_space<vmem>>, vector<1x8x128xf32>
    %13 = vector.shape_cast %12 : vector<1x8x128xf32> to vector<8x128xf32>
    %c7 = arith.constant 7 : index
    %c0_14 = arith.constant 0 : index
    %c0_15 = arith.constant 0 : index
    %14 = vector.load %arg1[%c7, %c0_14, %c0_15] : memref<8x8x128xf32, #tpu.memory_space<vmem>>, vector<1x8x128xf32>
    %15 = vector.shape_cast %14 : vector<1x8x128xf32> to vector<8x128xf32>
    %16 = arith.subf %5, %1 : vector<8x128xf32>
    %17 = arith.subf %7, %3 : vector<8x128xf32>
    %18 = arith.mulf %16, %17 : vector<8x128xf32>
    %19 = arith.subf %13, %9 : vector<8x128xf32>
    %20 = arith.subf %15, %11 : vector<8x128xf32>
    %21 = arith.mulf %19, %20 : vector<8x128xf32>
    %22 = arith.maximumf %1, %9 : vector<8x128xf32>
    %23 = arith.maximumf %3, %11 : vector<8x128xf32>
    %24 = arith.minimumf %5, %13 : vector<8x128xf32>
    %25 = arith.minimumf %7, %15 : vector<8x128xf32>
    %26 = arith.subf %24, %22 : vector<8x128xf32>
    %cst = arith.constant 0.000000e+00 : f32
    %27 = vector.broadcast %cst : f32 to vector<8x128xf32>
    %28 = arith.maximumf %26, %27 : vector<8x128xf32>
    %29 = arith.subf %25, %23 : vector<8x128xf32>
    %cst_16 = arith.constant 0.000000e+00 : f32
    %30 = vector.broadcast %cst_16 : f32 to vector<8x128xf32>
    %31 = arith.maximumf %29, %30 : vector<8x128xf32>
    %32 = arith.mulf %28, %31 : vector<8x128xf32>
    %33 = arith.addf %18, %21 : vector<8x128xf32>
    %34 = arith.subf %33, %32 : vector<8x128xf32>
    %35 = tpu.reciprocal %34 : vector<8x128xf32> -> vector<8x128xf32>
    %36 = arith.mulf %32, %35 : vector<8x128xf32>
    %c0_17 = arith.constant 0 : index
    %c0_18 = arith.constant 0 : index
    %37 = vector.load %arg2[%c0_17, %c0_18] : memref<8x128xf32, #tpu.memory_space<vmem>>, vector<8x128xf32>
    tpu.vector_store %arg2[%c0_17, %c0_18], %36 {strides = array<i32>} : memref<8x128xf32, #tpu.memory_space<vmem>>, vector<8x128xf32>,
    return
  }
  func.func @transform_0(%arg0: i32) -> (i32, i32, i32) {
    %c0_i32 = arith.constant 0 : i32
    %c0_i32_0 = arith.constant 0 : i32
    %c0_i32_1 = arith.constant 0 : i32
    return %c0_i32, %arg0, %c0_i32_0 : i32, i32, i32
  }
  func.func @transform_1(%arg0: i32) -> (i32, i32) {
    %c0_i32 = arith.constant 0 : i32
    %c0_i32_0 = arith.constant 0 : i32
    return %arg0, %c0_i32 : i32, i32
  }
}

</mosaic_0001>

<bundles_post_ra>
// kernel: iou_of.1
= control target key start
LH: loop header
LB: loop body
LE: loop exit
PB: predicated region body
PF: predicated region fallthrough
CT: control target
= control target key end

     0   :  { %s93_s0 = inlined_call_operand.vmem [shape: f32[8,8,128], index: 0, kind: input, shape index: {}]   ;;  %s94_s1 = inlined_call_operand.vmem [shape: f32[8,128], index: 1, kind: output, shape index: {}]  }
   0x1   :  { %v8_v0 = vld [vmem:[%s93_s0] sm:$0xff]  ;;  %v47_v1 = vld [vmem:[%s93_s0 + $0x8] sm:$0xff]  ;;  %v48_v2 = vld [vmem:[%s93_s0 + $0x10] sm:$0xff] }
   0x2   :  { %v49_v3 = vld [vmem:[%s93_s0 + $0x18] sm:$0xff]  ;;  %v50_v4 = vld [vmem:[%s93_s0 + $0x20] sm:$0xff]  ;;  %v51_v5 = vld [vmem:[%s93_s0 + $0x28] sm:$0xff]  ;;  %v23_v6 = vsub.f32 %v48_v2, %v8_v0 }
   0x3   :  { %v52_v7 = vld [vmem:[%s93_s0 + $0x30] sm:$0xff]  ;;  %v53_v8 = vld [vmem:[%s93_s0 + $0x38] sm:$0xff]  ;;  %v24_v9 = vsub.f32 %v49_v3, %v47_v1  ;;  %v29_v10 = vmax.f32 %v8_v0, %v50_v4  ;;  %v30_v11 = vmax.f32 %v47_v1, %v51_v5 }
   0x4   :  { %v26_v12 = vsub.f32 %v52_v7, %v50_v4  ;;  %v27_v13 = vsub.f32 %v53_v8, %v51_v5  ;;  %v31_v14 = vmin.f32 %v48_v2, %v52_v7  ;;  %v32_v15 = vmin.f32 %v49_v3, %v53_v8 }
   0x5   :  { %v25_v16 = vmul.f32 %v24_v9, %v23_v6 }
   0x6   :  { %v28_v17 = vmul.f32 %v27_v13, %v26_v12  ;;  %v33_v18 = vsub.f32 %v31_v14, %v29_v10  ;;  %v35_v19 = vsub.f32 %v32_v15, %v30_v11 }
   0x8   :  { %v34_v20 = vmax.f32 %v33_v18, 0.0  ;;  %v36_v21 = vmax.f32 %v35_v19, 0.0  ;;  %v38_v22 = vadd.f32 %v28_v17, %v25_v16 }
   0xa   :  { %v37_v23 = vmul.f32 %v36_v21, %v34_v20 }
   0xc   :  { %v39_v24 = vsub.f32 %v38_v22, %v37_v23 }
   0xe   :  { %54 = vrcp.f32 %v39_v24 }
  0x18   :  { %v55_v25 = vpop.eup %54 }
  0x19   :  { %v41_v26 = vmul.f32 %v55_v25, %v37_v23 }
  0x1b   :  { %42 = vst [vmem:[%s94_s1] sm:$0xff] %v41_v26 }

</bundles_post_ra>
